<compile_context>
chip_gen: v5e
topology: v5e:2x2
jax: 0.10.0
libtpu: 0.0.40
codegen_flags: <defaults>
</compile_context>

<pallas_src>
import jax
import jax.numpy as jnp
from jax.experimental import pallas as pl
from jax.experimental.pallas import tpu as pltpu


def decoder_kernel(x_ref,                     # (d_in, tile_b)  feature-major input
                   w1_ref, b1_ref,            # (16, 8),  (16, 1)
                   w2_ref, b2_ref,            # (32, 16), (32, 1)
                   w3_ref, b3_ref,            # (64, 32), (64, 1)
                   w4t_ref, b4_ref,           # (64, 128) = (in, out), (1, 128)
                   o_ref):                    # (tile_b, d_out) batch-major output
    mxu = w1_ref.dtype                        # bf16 by default, f32 optional
    # Weights/biases are tiny and VMEM-resident; load once (hoisted out of the loop).
    w1 = w1_ref[...]; w2 = w2_ref[...]; w3 = w3_ref[...]; w4t = w4t_ref[...]
    b1 = b1_ref[...]; b2 = b2_ref[...]; b3 = b3_ref[...]; b4 = b4_ref[...]

    n_cols = x_ref.shape[1] // 128            # static: batch columns per grid step

    def col_body(c, carry):
        c0 = pl.multiple_of(c * 128, 128)
        # Input cast to the MXU dtype happens in-kernel (no wrapper HBM pass over x).
        xc = x_ref[:, pl.ds(c0, 128)].astype(mxu)                            # (d_in, 128)

        # fc1..fc3: feature-major, f32 accumulate, lane-dense bias+ReLU.
        h = jnp.dot(w1, xc, preferred_element_type=jnp.float32) + b1         # (16, 128)
        h = jnp.maximum(h, 0.0)
        h = jnp.dot(w2, h.astype(mxu), preferred_element_type=jnp.float32) + b2   # (32, 128)
        h = jnp.maximum(h, 0.0)
        h = jnp.dot(w3, h.astype(mxu), preferred_element_type=jnp.float32) + b3   # (64, 128)
        h = jnp.maximum(h, 0.0)

        # Flip to batch-major once, on the smallest tensor that needs it (f32 XLU transpose).
        hb = jnp.transpose(h).astype(mxu)                                    # (128, 64)

        # fc4: batch-major so the output tile lands in (batch, out) orientation.
        o = jnp.dot(hb, w4t, preferred_element_type=jnp.float32) + b4        # (128, d_out)
        # Sigmoid via tanh: one EUP push; mul/add ride the VALU which has slack.
        o = 0.5 * (jnp.tanh(0.5 * o) + 1.0)

        o_ref[pl.ds(c0, 128), :] = o.astype(o_ref.dtype)
        return carry

    jax.lax.fori_loop(0, n_cols, col_body, 0, unroll=True)


def decoder_forward(x, params, *, tile_b=2048, use_bf16=True, out_dtype=jnp.float32):
    """x: (B, smallLayer). params: list of (W, b) in PyTorch orientation:
    W shaped (out_features, in_features), b shaped (out_features,)."""
    (w1, b1), (w2, b2), (w3, b3), (w4, b4) = params
    B, d_in = x.shape
    d_out = w4.shape[0]

    mxu_dtype = jnp.bfloat16 if use_bf16 else jnp.float32

    # Feature-major input: (d_in, B) with the batch on the lane axis.  Pad the batch
    # only up to the next multiple of 128 (x is tiny: d_in * B floats).
    b_pad = pl.cdiv(B, 128) * 128
    x_t = x.T
    if b_pad != B:
        x_t = jnp.pad(x_t, ((0, 0), (0, b_pad - B)))

    # Batch tile: multiple of 128 lanes, capped to the padded batch, and kept to
    # >= 2 grid steps when the batch allows it (v7x megacore / pipelining).
    tile_b = max(128, (int(tile_b) // 128) * 128)
    tile_b = min(tile_b, b_pad)
    if b_pad >= 2 * 128:
        tile_b = min(tile_b, max(128, (b_pad // 2 // 128) * 128))
    grid = (pl.cdiv(b_pad, tile_b),)

    # Operand layouts (see checkpoint-conversion note at top of file).
    w1k = w1.astype(mxu_dtype)                       # (16, 8)
    w2k = w2.astype(mxu_dtype)                       # (32, 16)
    w3k = w3.astype(mxu_dtype)                       # (64, 32)
    w4k = w4.T.astype(mxu_dtype)                     # (64, 128) = (in, out)
    b1k = b1.reshape(-1, 1).astype(jnp.float32)      # (16, 1)
    b2k = b2.reshape(-1, 1).astype(jnp.float32)      # (32, 1)
    b3k = b3.reshape(-1, 1).astype(jnp.float32)      # (64, 1)
    b4k = b4.reshape(1, -1).astype(jnp.float32)      # (1, 128)

    def resident(a):
        # Whole array as one block, same block every step -> stays VMEM-resident.
        return pl.BlockSpec(a.shape, lambda i: (0, 0))

    in_specs = [pl.BlockSpec((d_in, tile_b), lambda i: (0, i))]
    for a in (w1k, b1k, w2k, b2k, w3k, b3k, w4k, b4k):
        in_specs.append(resident(a))
    out_spec = pl.BlockSpec((tile_b, d_out), lambda i: (i, 0))

    layer_dims = [(w1.shape[1], w1.shape[0]), (w2.shape[1], w2.shape[0]),
                  (w3.shape[1], w3.shape[0]), (w4.shape[1], w4.shape[0])]
    flops = 2 * b_pad * sum(i * o for i, o in layer_dims)
    bytes_accessed = (
        x_t.size * x_t.dtype.itemsize
        + sum(a.size * a.dtype.itemsize for a in (w1k, w2k, w3k, w4k, b1k, b2k, b3k, b4k))
        + b_pad * d_out * jnp.dtype(out_dtype).itemsize)
    cost = pl.CostEstimate(flops=flops, transcendentals=b_pad * d_out,
                           bytes_accessed=bytes_accessed)

    out = pl.pallas_call(
        decoder_kernel,
        out_shape=jax.ShapeDtypeStruct((b_pad, d_out), out_dtype),
        grid=grid,
        in_specs=in_specs,
        out_specs=out_spec,
        compiler_params=pltpu.CompilerParams(
            dimension_semantics=("parallel",),   # batch axis shards across TCs on v7x
        ),
        cost_estimate=cost,
    )(x_t, w1k, b1k, w2k, b2k, w3k, b3k, w4k, b4k)

    return out[:B]


def make_linear_params(key, in_features, out_features):
    """Deterministic init mimicking nn.Linear: W (out, in), b (out,), U(-1/sqrt(in), 1/sqrt(in))."""
    kw, kb = jax.random.split(key)
    bound = 1.0 / jnp.sqrt(jnp.float32(in_features))
    w = jax.random.uniform(kw, (out_features, in_features), jnp.float32, -bound, bound)
    b = jax.random.uniform(kb, (out_features,), jnp.float32, -bound, bound)
    return w, b


def reference_forward(x, params):
    h = x
    for i, (w, b) in enumerate(params):
        h = jnp.dot(h, w.T, precision=jax.lax.Precision.HIGHEST) + b
        h = jnp.maximum(h, 0.0) if i < 3 else jax.nn.sigmoid(h)
    return h


if __name__ == "__main__":
    # Decoder(bigLayer=128, bigMidLayer=64, midLayer=32, midSmallLayer=16, smallLayer=8)
    smallLayer, midSmallLayer, midLayer, bigMidLayer, bigLayer = 8, 16, 32, 64, 128

    key = jax.random.PRNGKey(0)
    k_x, k1, k2, k3, k4 = jax.random.split(key, 5)
    params = [
        make_linear_params(k1, smallLayer, midSmallLayer),
        make_linear_params(k2, midSmallLayer, midLayer),
        make_linear_params(k3, midLayer, bigMidLayer),
        make_linear_params(k4, bigMidLayer, bigLayer),
    ]

    # Tiny batch, ragged (pad-to-128) batch, and multi-grid-step batches.
    for B in (2, 100, 1000, 2048):
        x = jax.random.normal(jax.random.fold_in(k_x, B), (B, smallLayer), jnp.float32)
        ref = reference_forward(x, params)

        # Default path: bf16 MXU operands, f32 accumulate/output (loosened tolerance
        # is expected bf16 quantization error, not a bug).
        out_bf16 = jax.block_until_ready(decoder_forward(x, params))
        assert out_bf16.shape == (B, bigLayer), (out_bf16.shape, B)
        err = float(jnp.max(jnp.abs(out_bf16 - ref)))
        assert jnp.allclose(out_bf16, ref, atol=3e-2), f"bf16 mismatch B={B}, max_err={err}"

        # Full-f32 operand path (tighter tolerance).
        out_f32 = jax.block_until_ready(decoder_forward(x, params, use_bf16=False))
        err = float(jnp.max(jnp.abs(out_f32 - ref)))
        assert jnp.allclose(out_f32, ref, atol=5e-3), f"f32 mismatch B={B}, max_err={err}"

    print("KERNEL_OK")
</pallas_src>

<mosaic_0001>
module attributes {stable_mosaic.version = 11 : i64} {
  func.func @decoder_kernel(%arg0: i32, %arg1: memref<8x128xf32, #tpu.memory_space<vmem>>, %arg2: memref<16x8xbf16, #tpu.memory_space<vmem>>, %arg3: memref<16x1xf32, #tpu.memory_space<vmem>>, %arg4: memref<32x16xbf16, #tpu.memory_space<vmem>>, %arg5: memref<32x1xf32, #tpu.memory_space<vmem>>, %arg6: memref<64x32xbf16, #tpu.memory_space<vmem>>, %arg7: memref<64x1xf32, #tpu.memory_space<vmem>>, %arg8: memref<64x128xbf16, #tpu.memory_space<vmem>>, %arg9: memref<1x128xf32, #tpu.memory_space<vmem>>, %arg10: memref<128x128xf32, #tpu.memory_space<vmem>>) attributes {dimension_semantics = [#tpu.dimension_semantics<parallel>], iteration_bounds = array<i64: 1>, scalar_prefetch = 0 : i64, scratch_operands = 0 : i64, tpu.core_type = #tpu.core_type<tc>, window_params = [{transform_indices = @transform_0, window_bounds = array<i64: 8, 128>}, {pipeline_mode = #tpu.pipeline_mode<synchronous>, transform_indices = @transform_1, window_bounds = array<i64: 16, 8>}, {pipeline_mode = #tpu.pipeline_mode<synchronous>, transform_indices = @transform_2, window_bounds = array<i64: 16, 1>}, {pipeline_mode = #tpu.pipeline_mode<synchronous>, transform_indices = @transform_3, window_bounds = array<i64: 32, 16>}, {pipeline_mode = #tpu.pipeline_mode<synchronous>, transform_indices = @transform_4, window_bounds = array<i64: 32, 1>}, {pipeline_mode = #tpu.pipeline_mode<synchronous>, transform_indices = @transform_5, window_bounds = array<i64: 64, 32>}, {pipeline_mode = #tpu.pipeline_mode<synchronous>, transform_indices = @transform_6, window_bounds = array<i64: 64, 1>}, {pipeline_mode = #tpu.pipeline_mode<synchronous>, transform_indices = @transform_7, window_bounds = array<i64: 64, 128>}, {pipeline_mode = #tpu.pipeline_mode<synchronous>, transform_indices = @transform_8, window_bounds = array<i64: 1, 128>}, {transform_indices = @transform_9, window_bounds = array<i64: 128, 128>}]} {
    %c0 = arith.constant 0 : index
    %c0_0 = arith.constant 0 : index
    %0 = vector.load %arg2[%c0, %c0_0] : memref<16x8xbf16, #tpu.memory_space<vmem>>, vector<16x8xbf16>
    %c0_1 = arith.constant 0 : index
    %c0_2 = arith.constant 0 : index
    %1 = vector.load %arg4[%c0_1, %c0_2] : memref<32x16xbf16, #tpu.memory_space<vmem>>, vector<32x16xbf16>
    %c0_3 = arith.constant 0 : index
    %c0_4 = arith.constant 0 : index
    %2 = vector.load %arg6[%c0_3, %c0_4] : memref<64x32xbf16, #tpu.memory_space<vmem>>, vector<64x32xbf16>
    %c0_5 = arith.constant 0 : index
    %c0_6 = arith.constant 0 : index
    %3 = vector.load %arg8[%c0_5, %c0_6] : memref<64x128xbf16, #tpu.memory_space<vmem>>, vector<64x128xbf16>
    %c0_7 = arith.constant 0 : index
    %c0_8 = arith.constant 0 : index
    %4 = vector.load %arg3[%c0_7, %c0_8] : memref<16x1xf32, #tpu.memory_space<vmem>>, vector<16x1xf32>
    %c0_9 = arith.constant 0 : index
    %c0_10 = arith.constant 0 : index
    %5 = vector.load %arg5[%c0_9, %c0_10] : memref<32x1xf32, #tpu.memory_space<vmem>>, vector<32x1xf32>
    %c0_11 = arith.constant 0 : index
    %c0_12 = arith.constant 0 : index
    %6 = vector.load %arg7[%c0_11, %c0_12] : memref<64x1xf32, #tpu.memory_space<vmem>>, vector<64x1xf32>
    %c0_13 = arith.constant 0 : index
    %c0_14 = arith.constant 0 : index
    %7 = vector.load %arg9[%c0_13, %c0_14] : memref<1x128xf32, #tpu.memory_space<vmem>>, vector<1x128xf32>
    %c0_i32 = arith.constant 0 : i32
    %c128_i32 = arith.constant 128 : i32
    %8 = arith.muli %c0_i32, %c128_i32 : i32
    %9 = tpu.assume_multiple %8, 128 : i32
    %c0_15 = arith.constant 0 : index
    %10 = arith.index_cast %9 : i32 to index
    %11 = vector.load %arg1[%c0_15, %10] : memref<8x128xf32, #tpu.memory_space<vmem>>, vector<8x128xf32>
    %12 = arith.truncf %11 : vector<8x128xf32> to vector<8x128xbf16>
    %cst = arith.constant dense<0.000000e+00> : vector<16x128xf32>
    %13 = tpu.matmul %0, %12, %cst {dimension_numbers = #tpu.dot_dimension_numbers<[1], [0], [0], [1], [0, 0, 1, 1], [], []>} : vector<16x8xbf16>, vector<8x128xbf16>, vector<16x128xf32> -> vector<16x128xf32>
    %14 = vector.broadcast %4 : vector<16x1xf32> to vector<16x128xf32>
    %15 = arith.addf %13, %14 : vector<16x128xf32>
    %cst_16 = arith.constant 0.000000e+00 : f32
    %16 = vector.broadcast %cst_16 : f32 to vector<16x128xf32>
    %17 = arith.maximumf %15, %16 : vector<16x128xf32>
    %18 = arith.truncf %17 : vector<16x128xf32> to vector<16x128xbf16>
    %cst_17 = arith.constant dense<0.000000e+00> : vector<32x128xf32>
    %19 = tpu.matmul %1, %18, %cst_17 {dimension_numbers = #tpu.dot_dimension_numbers<[1], [0], [0], [1], [0, 0, 1, 1], [], []>} : vector<32x16xbf16>, vector<16x128xbf16>, vector<32x128xf32> -> vector<32x128xf32>
    %20 = vector.broadcast %5 : vector<32x1xf32> to vector<32x128xf32>
    %21 = arith.addf %19, %20 : vector<32x128xf32>
    %cst_18 = arith.constant 0.000000e+00 : f32
    %22 = vector.broadcast %cst_18 : f32 to vector<32x128xf32>
    %23 = arith.maximumf %21, %22 : vector<32x128xf32>
    %24 = arith.truncf %23 : vector<32x128xf32> to vector<32x128xbf16>
    %cst_19 = arith.constant dense<0.000000e+00> : vector<64x128xf32>
    %25 = tpu.matmul %2, %24, %cst_19 {dimension_numbers = #tpu.dot_dimension_numbers<[1], [0], [0], [1], [0, 0, 1, 1], [], []>} : vector<64x32xbf16>, vector<32x128xbf16>, vector<64x128xf32> -> vector<64x128xf32>
    %26 = vector.broadcast %6 : vector<64x1xf32> to vector<64x128xf32>
    %27 = arith.addf %25, %26 : vector<64x128xf32>
    %cst_20 = arith.constant 0.000000e+00 : f32
    %28 = vector.broadcast %cst_20 : f32 to vector<64x128xf32>
    %29 = arith.maximumf %27, %28 : vector<64x128xf32>
    %30 = tpu.transpose %29, [1, 0] : vector<64x128xf32> -> vector<128x64xf32>
    %31 = arith.truncf %30 : vector<128x64xf32> to vector<128x64xbf16>
    %cst_21 = arith.constant dense<0.000000e+00> : vector<128x128xf32>
    %32 = tpu.matmul %31, %3, %cst_21 {dimension_numbers = #tpu.dot_dimension_numbers<[1], [0], [0], [1], [0, 0, 1, 1], [], []>} : vector<128x64xbf16>, vector<64x128xbf16>, vector<128x128xf32> -> vector<128x128xf32>
    %33 = vector.broadcast %7 : vector<1x128xf32> to vector<128x128xf32>
    %34 = arith.addf %32, %33 : vector<128x128xf32>
    %cst_22 = arith.constant 5.000000e-01 : f32
    %35 = vector.broadcast %cst_22 : f32 to vector<128x128xf32>
    %36 = arith.mulf %35, %34 : vector<128x128xf32>
    %37 = math.tanh %36 : vector<128x128xf32>
    %cst_23 = arith.constant 1.000000e+00 : f32
    %38 = vector.broadcast %cst_23 : f32 to vector<128x128xf32>
    %39 = arith.addf %37, %38 : vector<128x128xf32>
    %cst_24 = arith.constant 5.000000e-01 : f32
    %40 = vector.broadcast %cst_24 : f32 to vector<128x128xf32>
    %41 = arith.mulf %40, %39 : vector<128x128xf32>
    %42 = arith.index_cast %9 : i32 to index
    %c0_25 = arith.constant 0 : index
    %43 = vector.load %arg10[%42, %c0_25] : memref<128x128xf32, #tpu.memory_space<vmem>>, vector<128x128xf32>
    tpu.vector_store %arg10[%42, %c0_25], %41 {strides = array<i32>} : memref<128x128xf32, #tpu.memory_space<vmem>>, vector<128x128xf32>,
    %c1_i32 = arith.constant 1 : i32
    return
  }
  func.func @transform_0(%arg0: i32) -> (i32, i32) {
    %c0_i32 = arith.constant 0 : i32
    %c0_i32_0 = arith.constant 0 : i32
    return %c0_i32, %arg0 : i32, i32
  }
  func.func @transform_1(%arg0: i32) -> (i32, i32) {
    %c0_i32 = arith.constant 0 : i32
    %c0_i32_0 = arith.constant 0 : i32
    %c0_i32_1 = arith.constant 0 : i32
    return %c0_i32, %c0_i32_0 : i32, i32
  }
  func.func @transform_2(%arg0: i32) -> (i32, i32) {
    %c0_i32 = arith.constant 0 : i32
    %c0_i32_0 = arith.constant 0 : i32
    %c0_i32_1 = arith.constant 0 : i32
    return %c0_i32, %c0_i32_0 : i32, i32
  }
  func.func @transform_3(%arg0: i32) -> (i32, i32) {
    %c0_i32 = arith.constant 0 : i32
    %c0_i32_0 = arith.constant 0 : i32
    %c0_i32_1 = arith.constant 0 : i32
    return %c0_i32, %c0_i32_0 : i32, i32
  }
  func.func @transform_4(%arg0: i32) -> (i32, i32) {
    %c0_i32 = arith.constant 0 : i32
    %c0_i32_0 = arith.constant 0 : i32
    %c0_i32_1 = arith.constant 0 : i32
    return %c0_i32, %c0_i32_0 : i32, i32
  }
  func.func @transform_5(%arg0: i32) -> (i32, i32) {
    %c0_i32 = arith.constant 0 : i32
    %c0_i32_0 = arith.constant 0 : i32
    %c0_i32_1 = arith.constant 0 : i32
    return %c0_i32, %c0_i32_0 : i32, i32
  }
  func.func @transform_6(%arg0: i32) -> (i32, i32) {
    %c0_i32 = arith.constant 0 : i32
    %c0_i32_0 = arith.constant 0 : i32
    %c0_i32_1 = arith.constant 0 : i32
    return %c0_i32, %c0_i32_0 : i32, i32
  }
  func.func @transform_7(%arg0: i32) -> (i32, i32) {
    %c0_i32 = arith.constant 0 : i32
    %c0_i32_0 = arith.constant 0 : i32
    %c0_i32_1 = arith.constant 0 : i32
    return %c0_i32, %c0_i32_0 : i32, i32
  }
  func.func @transform_8(%arg0: i32) -> (i32, i32) {
    %c0_i32 = arith.constant 0 : i32
    %c0_i32_0 = arith.constant 0 : i32
    %c0_i32_1 = arith.constant 0 : i32
    return %c0_i32, %c0_i32_0 : i32, i32
  }
  func.func @transform_9(%arg0: i32) -> (i32, i32) {
    %c0_i32 = arith.constant 0 : i32
    %c0_i32_0 = arith.constant 0 : i32
    return %arg0, %c0_i32 : i32, i32
  }
}

</mosaic_0001>

<bundles_post_ra>
// kernel: tpu_custom_call.1
= control target key start
LH: loop header
LB: loop body
LE: loop exit
PB: predicated region body
PF: predicated region fallthrough
CT: control target
= control target key end

     0   :  { %vm92_vm0 = vcmask 1043456   ;;  %v669_v2 = vmov 0   ;;  %s833_s0 = inlined_call_operand.vmem [shape: f32[8,128], index: 0, kind: input, shape index: {}]   ;;  %s834_s1 = inlined_call_operand.vmem [shape: bf16[16,8], index: 1, kind: input, shape index: {}]   ;;  %s835_s2 = inlined_call_operand.vmem [shape: f32[16,1], index: 2, kind: input, shape index: {}]   ;;  %s836_s3 = inlined_call_operand.vmem [shape: bf16[32,16], index: 3, kind: input, shape index: {}]   ;;  %s837_s4 = inlined_call_operand.vmem [shape: f32[32,1], index: 4, kind: input, shape index: {}]   ;;  %s838_s5 = inlined_call_operand.vmem [shape: bf16[64,32], index: 5, kind: input, shape index: {}]   ;;  %s839_s6 = inlined_call_operand.vmem [shape: f32[64,1], index: 6, kind: input, shape index: {}]   ;;  %s840_s7 = inlined_call_operand.vmem [shape: bf16[64,128], index: 7, kind: input, shape index: {}]   ;;  %s841_s8 = inlined_call_operand.vmem [shape: f32[1,128], index: 8, kind: input, shape index: {}]   ;;  %s842_s9 = inlined_call_operand.hbm [shape: f32[128,128], index: 9, kind: output, shape index: {}]  }
   0x1   :  { %v56_v0 = vld [vmem:[%s835_s2] sm:$0xff]  ;;  %607 = vset.pattern.permute.xlu0 %v669_v2  ;;  %608 = vset.pattern.permute.xlu1 %v669_v2 }
   0x2   :  { %v71_v1 = vld [vmem:[%s833_s0] sm:$0xff]  ;;  %75 = vperm.xlu0 %607, %v56_v0   ;;  %609 = vset.pattern.permute.xlu2 %v669_v2 }
   0x3   :  { %v72_v3 = vpack.c.bf16 %v71_v1, %v71_v1 }
   0x4   :  { %14 = vsyncpa [#allocation3], 0  ;;  %v583_v5 = vld [vmem:[%s834_s1] sm:$0xff]  ;;  %vm88_vm1 = vcmask 64512   ;;  %v57_v6 = vld [vmem:[%s835_s2 + $0x8] sm:$0xff]  ;;  %vm143_vm2 = vcmask 130048  }
   0x5   :  { %v94_v4 = vsel %vm92_vm0, %v72_v3, 0  ;;  %v62_v7 = vld [vmem:[%s839_s6] sm:$0xff]  ;;  %v65_v8 = vld [vmem:[%s839_s6 + $0x18] sm:$0xff]  ;;  %v68_v9 = vld [vmem:[%s839_s6 + $0x30] sm:$0xff]  ;;  %vm235_vm3 = vcmask 261120   ;;  %vm352_vm4 = vcmask 523264  }
   0x6   :  { %103 = vmatpush.bf16.msra.mxu0 %v94_v4  ;;  %v60_v10 = vld [vmem:[%s837_s4 + $0x10] sm:$0xff]  ;;  %v61_v11 = vld [vmem:[%s837_s4 + $0x18] sm:$0xff]  ;;  %v63_v12 = vld [vmem:[%s839_s6 + $0x8] sm:$0xff]  ;;  %s512_s13 = sshll.u32 %s842_s9, 4  ;;  %s671_s14 = smov 128   ;;  %s513_s13 = int_to_ptr.hbm [resolvable:$true] %s512_s13 }
   0x7   :  { %125 = vperm.xlu1 %608, %v60_v10   ;;  %v66_v15 = vld [vmem:[%s839_s6 + $0x20] sm:$0xff]  ;;  %v59_v20 = vld [vmem:[%s837_s4 + $0x8] sm:$0xff]  ;;  %v69_v22 = vld [vmem:[%s839_s6 + $0x38] sm:$0xff]  ;;  %s672_s15 = smov 8  }
   0x8   :  { %v58_v16 = vld [vmem:[%s837_s4] sm:$0xff]  ;;  %v64_v27 = vld [vmem:[%s839_s6 + $0x10] sm:$0xff]  ;;  %v67_v28 = vld [vmem:[%s839_s6 + $0x28] sm:$0xff] }
   0x9   :  { %528 = vmatmul.msk.bf16.vlgmr.msra.gmra.mxu0 %vm88_vm1, %v583_v5  ;;  %115 = vperm.xlu2 %609, %v58_v16   ;;  %v584_v26 = vld [vmem:[%s836_s3] sm:$0xff]  ;;  %v585_v29 = vld [vmem:[%s836_s3 + $0x8] sm:$0xff]  ;;  %v588_v50 = vld [vmem:[%s838_s5 + $0x10] sm:$0xff] }
   0xa   :  { %80 = vperm.xlu0 %607, %v57_v6   ;;  %v586_v48 = vld [vmem:[%s838_s5] sm:$0xff]  ;;  %v587_v49 = vld [vmem:[%s838_s5 + $0x8] sm:$0xff]  ;;  %v589_v51 = vld [vmem:[%s838_s5 + $0x18] sm:$0xff] }
   0xb   :  { %v593_v4 = vld [vmem:[%s840_s7 + $0x18] sm:$0xff]  ;;  %v592_v5 = vld [vmem:[%s840_s7 + $0x10] sm:$0xff] }
   0xc   :  { %381 = vmatpush.bf16.msrb.mxu0 %v593_v4  ;;  %595 = vmatpush.bf16.msra.mxu3 %v593_v4 }
   0xf   :  { %130 = vperm.xlu1 %608, %v61_v11  }
  0x10   :  { %382 = vmatpush.bf16.msrb.mxu0 %v592_v5  ;;  %597 = vmatpush.bf16.msra.mxu3 %v592_v5 }
  0x11   :  { %120 = vperm.xlu2 %609, %v59_v20  }
  0x12   :  { %177 = vperm.xlu0 %607, %v62_v7  }
  0x17   :  { %182 = vperm.xlu1 %608, %v63_v12  }
  0x19   :  { %187 = vperm.xlu2 %609, %v64_v27  }
  0x1a   :  { %192 = vperm.xlu0 %607, %v65_v8  }
  0x1f   :  { %197 = vperm.xlu1 %608, %v66_v15  }
  0x21   :  { %202 = vperm.xlu2 %609, %v67_v28  }
  0x22   :  { %207 = vperm.xlu0 %607, %v68_v9  }
  0x27   :  { %212 = vperm.xlu1 %608, %v69_v22   ;;  %v591_v22 = vld [vmem:[%s840_s7 + $0x8] sm:$0xff] }
  0x28   :  { %383 = vmatpush.bf16.msrb.mxu0 %v591_v22  ;;  %599 = vmatpush.bf16.msra.mxu3 %v591_v22 }
  0x63   :  { %v116_v33 = vpop.permute.xlu2 %115 }
  0x6b   :  { %v121_v37 = vpop.permute.xlu2 %120 }
  0x73   :  { %v188_v60 = vpop.permute.xlu2 %187 }
  0x74   :  { %v76_v13 = vpop.permute.xlu0 %75 }
  0x79   :  { %v126_v32 = vpop.permute.xlu1 %125 }
  0x7b   :  { %v203_v10 = vpop.permute.xlu2 %202 }
  0x7c   :  { %v81_v18 = vpop.permute.xlu0 %80 }
  0x81   :  { %v131_v35 = vpop.permute.xlu1 %130 }
  0x84   :  { %v178_v52 = vpop.permute.xlu0 %177 }
  0x86   :  { %v105_v14 = vpop.f32.mrf.mxu0 }
  0x87   :  { %v106_v17 = vadd.f32 %v105_v14, %v76_v13 }
  0x89   :  { %v110_v23 = vmax.f32 %v106_v17, 0.0  ;;  %v183_v56 = vpop.permute.xlu1 %182 }
  0x8c   :  { %v193_v0 = vpop.permute.xlu0 %192 }
  0x8e   :  { %v107_v19 = vpop.f32.mrf.mxu0 }
  0x8f   :  { %v108_v21 = vadd.f32 %v107_v19, %v81_v18 }
  0x91   :  { %v111_v24 = vmax.f32 %v108_v21, 0.0  ;;  %v198_v6 = vpop.permute.xlu1 %197 }
  0x93   :  { %v112_v25 = vpack.c.bf16 %v111_v24, %v110_v23  ;;  %v590_v23 = vld [vmem:[%s840_s7] sm:$0xff] }
  0x94   :  { %v208_v14 = vpop.permute.xlu0 %207  ;;  %384 = vmatpush.bf16.msrb.mxu0 %v590_v23  ;;  %601 = vmatpush.bf16.msra.mxu3 %v590_v23 }
  0x95   :  { %157 = vmatpush.bf16.msra.mxu1 %v112_v25 }
  0x98   :  { %537 = vmatmul.msk.bf16.vlgmr.msra.gmra.mxu1 %vm143_vm2, %v584_v26 }
  0x99   :  { %594 = vmatpush.bf16.msrb.mxu1 %v593_v4  ;;  %v213_v18 = vpop.permute.xlu1 %212 }
  0x9d   :  { %596 = vmatpush.bf16.msrb.mxu1 %v592_v5 }
  0xa1   :  { %598 = vmatpush.bf16.msrb.mxu1 %v591_v22 }
  0xa5   :  { %600 = vmatpush.bf16.msrb.mxu1 %v590_v23 }
  0xa8   :  { %538 = vmatmul.msk.bf16.gmra.mxu1 %vm143_vm2, %v585_v29 }
 0x115   :  { %v159_v30 = vpop.f32.mrf.mxu1 }
 0x116   :  { %v160_v41 = vadd.f32 %v159_v30, %v116_v33 }
 0x118   :  { %v169_v46 = vmax.f32 %v160_v41, 0.0 }
 0x11d   :  { %v161_v31 = vpop.f32.mrf.mxu1 }
 0x11e   :  { %v162_v39 = vadd.f32 %v161_v31, %v121_v37 }
 0x120   :  { %v170_v44 = vmax.f32 %v162_v39, 0.0 }
 0x122   :  { %v173_v47 = vpack.c.bf16 %v170_v44, %v169_v46 }
 0x125   :  { %v164_v34 = vpop.f32.mrf.mxu1 }
 0x126   :  { %v165_v36 = vadd.f32 %v164_v34, %v126_v32 }
 0x128   :  { %v171_v42 = vmax.f32 %v165_v36, 0.0 }
 0x12d   :  { %v166_v38 = vpop.f32.mrf.mxu1 }
 0x12e   :  { %v167_v40 = vadd.f32 %v166_v38, %v131_v35 }
 0x130   :  { %v172_v43 = vmax.f32 %v167_v40, 0.0 }
 0x132   :  { %v174_v45 = vpack.c.bf16 %v172_v43, %v171_v42 }
 0x134   :  { %254 = vmatpush.bf16.msra.mxu2 %v174_v45 }
 0x138   :  { %255 = vmatpush.bf16.msra.mxu2 %v173_v47 }
 0x13b   :  { %555 = vmatmul.msk.bf16.vlgmr.msra.gmra.mxu2 %vm235_vm3, %v586_v48  ;;  %v812_v48 = vld [vmem:[%s841_s8] ss:$0 sm:$0xff]  ;;  %s670_s8 = smov [#allocation2]  }
 0x13c   :  { %s510_s10 = sshll.u32 %s670_s8, 4  ;;  %s511_s10 = int_to_ptr.vmem [resolvable:$true] %s510_s10 }
 0x14b   :  { %556 = vmatmul.msk.bf16.gmra.mxu2 %vm235_vm3, %v587_v49 }
 0x15b   :  { %557 = vmatmul.msk.bf16.gmra.mxu2 %vm235_vm3, %v588_v50 }
 0x16b   :  { %558 = vmatmul.msk.bf16.gmra.mxu2 %vm235_vm3, %v589_v51 }
 0x1be   :  { %v257_v53 = vpop.f32.mrf.mxu2 }
 0x1bf   :  { %v258_v54 = vadd.f32 %v257_v53, %v178_v52 }
 0x1c1   :  { %v277_v55 = vmax.f32 %v258_v54, 0.0 }
 0x1c3   :  { %285 = vxpose.xlu2.b32.start [1/8] (short) %v277_v55, 128 }
 0x1c6   :  { %v259_v57 = vpop.f32.mrf.mxu2 }
 0x1c7   :  { %v260_v58 = vadd.f32 %v259_v57, %v183_v56 }
 0x1c9   :  { %v278_v59 = vmax.f32 %v260_v58, 0.0 }
 0x1cb   :  { %286 = vxpose.xlu2.b32.cont [2/8] (short) %v278_v59, 128 }
 0x1ce   :  { %v262_v61 = vpop.f32.mrf.mxu2 }
 0x1cf   :  { %v263_v62 = vadd.f32 %v262_v61, %v188_v60 }
 0x1d1   :  { %v279_v63 = vmax.f32 %v263_v62, 0.0 }
 0x1d3   :  { %287 = vxpose.xlu2.b32.cont [3/8] (short) %v279_v63, 128 }
 0x1d6   :  { %v264_v1 = vpop.f32.mrf.mxu2 }
 0x1d7   :  { %v265_v2 = vadd.f32 %v264_v1, %v193_v0 }
 0x1d9   :  { %v280_v3 = vmax.f32 %v265_v2, 0.0 }
 0x1db   :  { %288 = vxpose.xlu2.b32.cont [4/8] (short) %v280_v3, 128 }
 0x1de   :  { %v267_v7 = vpop.f32.mrf.mxu2 }
 0x1df   :  { %v268_v8 = vadd.f32 %v267_v7, %v198_v6 }
 0x1e1   :  { %v281_v9 = vmax.f32 %v268_v8, 0.0 }
 0x1e3   :  { %289 = vxpose.xlu2.b32.cont [5/8] (short) %v281_v9, 128 }
 0x1e6   :  { %v269_v11 = vpop.f32.mrf.mxu2 }
 0x1e7   :  { %v270_v12 = vadd.f32 %v269_v11, %v203_v10 }
 0x1e9   :  { %v282_v13 = vmax.f32 %v270_v12, 0.0 }
 0x1eb   :  { %290 = vxpose.xlu2.b32.cont [6/8] (short) %v282_v13, 128 }
 0x1ee   :  { %v272_v15 = vpop.f32.mrf.mxu2 }
 0x1ef   :  { %v273_v16 = vadd.f32 %v272_v15, %v208_v14 }
 0x1f1   :  { %v283_v17 = vmax.f32 %v273_v16, 0.0 }
 0x1f3   :  { %291 = vxpose.xlu2.b32.cont [7/8] (short) %v283_v17, 128 }
 0x1f6   :  { %v274_v19 = vpop.f32.mrf.mxu2 }
 0x1f7   :  { %v275_v20 = vadd.f32 %v274_v19, %v213_v18 }
 0x1f9   :  { %v284_v21 = vmax.f32 %v275_v20, 0.0 }
 0x1fb   :  { %292 = vxpose.xlu2.b32.end [8/8] (short) %v284_v21, 128 }
 0x25c   :  { %v301_v24 = vpop.trf.xlu2 }
 0x264   :  { %v302_v25 = vpop.trf.xlu2 }
 0x265   :  { %v317_v26 = vpack.c.bf16 %v302_v25, %v301_v24 }
 0x267   :  { %575 = vmatmul.msk.bf16.vlgmr.msrb.gmra.mxu0 %vm352_vm4, %v317_v26 }
 0x26c   :  { %v303_v27 = vpop.trf.xlu2 }
 0x274   :  { %v304_v28 = vpop.trf.xlu2 }
 0x275   :  { %v318_v29 = vpack.c.bf16 %v304_v28, %v303_v27 }
 0x277   :  { %576 = vmatmul.msk.bf16.gmra.mxu0 %vm352_vm4, %v318_v29 }
 0x27c   :  { %v305_v30 = vpop.trf.xlu2 }
 0x284   :  { %v306_v31 = vpop.trf.xlu2 }
 0x285   :  { %v319_v32 = vpack.c.bf16 %v306_v31, %v305_v30 }
 0x287   :  { %577 = vmatmul.msk.bf16.gmra.mxu0 %vm352_vm4, %v319_v32 }
 0x28c   :  { %v307_v33 = vpop.trf.xlu2 }
 0x294   :  { %v308_v34 = vpop.trf.xlu2 }
 0x295   :  { %v320_v35 = vpack.c.bf16 %v308_v34, %v307_v33 }
 0x297   :  { %578 = vmatmul.msk.bf16.vlgmr.msrb.gmra.mxu1 %vm352_vm4, %v320_v35 }
 0x29c   :  { %v309_v36 = vpop.trf.xlu2 }
 0x2a4   :  { %v310_v37 = vpop.trf.xlu2 }
 0x2a5   :  { %v321_v38 = vpack.c.bf16 %v310_v37, %v309_v36 }
 0x2a7   :  { %579 = vmatmul.msk.bf16.vlgmr.msra.gmra.mxu3 %vm352_vm4, %v321_v38 }
 0x2ac   :  { %v311_v39 = vpop.trf.xlu2 }
 0x2b4   :  { %v312_v40 = vpop.trf.xlu2 }
 0x2b5   :  { %v322_v41 = vpack.c.bf16 %v312_v40, %v311_v39 }
 0x2b7   :  { %580 = vmatmul.msk.bf16.gmra.mxu3 %vm352_vm4, %v322_v41 }
 0x2bc   :  { %v313_v42 = vpop.trf.xlu2 }
 0x2c4   :  { %v314_v43 = vpop.trf.xlu2 }
 0x2c5   :  { %v323_v44 = vpack.c.bf16 %v314_v43, %v313_v42 }
 0x2c7   :  { %581 = vmatmul.msk.bf16.gmra.mxu3 %vm352_vm4, %v323_v44 }
 0x2cc   :  { %v315_v45 = vpop.trf.xlu2 }
 0x2d4   :  { %v316_v46 = vpop.trf.xlu2 }
 0x2d5   :  { %v324_v47 = vpack.c.bf16 %v316_v46, %v315_v45 }
 0x2d7   :  { %582 = vmatmul.msk.bf16.gmra.mxu3 %vm352_vm4, %v324_v47 }
 0x2e4   :  { %v386_v49 = vpop.f32.mrf.mxu0 }
 0x2e5   :  { %v387_v50 = vadd.f32 %v812_v48, %v386_v49 }
 0x2e7   :  { %v426_v51 = vmul.f32 0.5, %v387_v50 }
 0x2e9   :  { %611 = vtanh.f32 %v426_v51 }
 0x2ec   :  { %v388_v52 = vpop.f32.mrf.mxu0 }
 0x2ed   :  { %v389_v53 = vadd.f32 %v812_v48, %v388_v52 }
 0x2ef   :  { %v612_v54 = vpop.eup %611  ;;  %v427_v55 = vmul.f32 0.5, %v389_v53 }
 0x2f0   :  { %v458_v56 = vadd.f32 1.0, %v612_v54 }
 0x2f1   :  { %613 = vtanh.f32 %v427_v55 }
 0x2f2   :  { %v474_v57 = vmul.f32 0.5, %v458_v56 }
 0x2f4   :  { %490 = vst [vmem:[#allocation2] sm:$0xff] %v474_v57  ;;  %v391_v58 = vpop.f32.mrf.mxu0 }
 0x2f5   :  { %v392_v59 = vadd.f32 %v812_v48, %v391_v58 }
 0x2f7   :  { %v614_v60 = vpop.eup %613  ;;  %v428_v61 = vmul.f32 0.5, %v392_v59 }
 0x2f8   :  { %v459_v62 = vadd.f32 1.0, %v614_v60 }
 0x2f9   :  { %615 = vtanh.f32 %v428_v61 }
 0x2fa   :  { %v475_v63 = vmul.f32 0.5, %v459_v62 }
 0x2fc   :  { %491 = vst [vmem:[#allocation2 + $0x8] sm:$0xff] %v475_v63  ;;  %v393_v0 = vpop.f32.mrf.mxu0 }
 0x2fd   :  { %v394_v1 = vadd.f32 %v812_v48, %v393_v0 }
 0x2ff   :  { %v616_v2 = vpop.eup %615  ;;  %v429_v3 = vmul.f32 0.5, %v394_v1 }
 0x300   :  { %v460_v4 = vadd.f32 1.0, %v616_v2 }
 0x301   :  { %617 = vtanh.f32 %v429_v3 }
 0x302   :  { %v476_v5 = vmul.f32 0.5, %v460_v4 }
 0x304   :  { %492 = vst [vmem:[#allocation2 + $0x10] sm:$0xff] %v476_v5  ;;  %v396_v6 = vpop.f32.mrf.mxu0 }
 0x305   :  { %v397_v7 = vadd.f32 %v812_v48, %v396_v6 }
 0x307   :  { %v618_v8 = vpop.eup %617  ;;  %v430_v9 = vmul.f32 0.5, %v397_v7 }
 0x308   :  { %v461_v10 = vadd.f32 1.0, %v618_v8 }
 0x309   :  { %619 = vtanh.f32 %v430_v9 }
 0x30a   :  { %v477_v11 = vmul.f32 0.5, %v461_v10 }
 0x30c   :  { %493 = vst [vmem:[#allocation2 + $0x18] sm:$0xff] %v477_v11  ;;  %v398_v12 = vpop.f32.mrf.mxu0 }
 0x30d   :  { %v399_v13 = vadd.f32 %v812_v48, %v398_v12 }
 0x30f   :  { %v620_v14 = vpop.eup %619  ;;  %v431_v15 = vmul.f32 0.5, %v399_v13 }
 0x310   :  { %v462_v16 = vadd.f32 1.0, %v620_v14 }
 0x311   :  { %621 = vtanh.f32 %v431_v15 }
 0x312   :  { %v478_v17 = vmul.f32 0.5, %v462_v16 }
 0x314   :  { %494 = vst [vmem:[#allocation2 + $0x20] sm:$0xff] %v478_v17  ;;  %v401_v18 = vpop.f32.mrf.mxu1 }
 0x315   :  { %v402_v19 = vadd.f32 %v812_v48, %v401_v18 }
 0x317   :  { %v622_v20 = vpop.eup %621  ;;  %v432_v21 = vmul.f32 0.5, %v402_v19 }
 0x318   :  { %v463_v22 = vadd.f32 1.0, %v622_v20 }
 0x319   :  { %623 = vtanh.f32 %v432_v21 }
 0x31a   :  { %v479_v23 = vmul.f32 0.5, %v463_v22 }
 0x31c   :  { %495 = vst [vmem:[#allocation2 + $0x28] sm:$0xff] %v479_v23  ;;  %v403_v24 = vpop.f32.mrf.mxu1 }
 0x31d   :  { %v404_v25 = vadd.f32 %v812_v48, %v403_v24 }
 0x31f   :  { %v624_v26 = vpop.eup %623  ;;  %v433_v27 = vmul.f32 0.5, %v404_v25 }
 0x320   :  { %v464_v28 = vadd.f32 1.0, %v624_v26 }
 0x321   :  { %625 = vtanh.f32 %v433_v27 }
 0x322   :  { %v480_v29 = vmul.f32 0.5, %v464_v28 }
 0x324   :  { %496 = vst [vmem:[#allocation2 + $0x30] sm:$0xff] %v480_v29 }
 0x327   :  { %v626_v30 = vpop.eup %625 }
 0x328   :  { %v465_v31 = vadd.f32 1.0, %v626_v30 }
 0x32a   :  { %v481_v32 = vmul.f32 0.5, %v465_v31  ;;  %v406_v33 = vpop.f32.mrf.mxu3 }
 0x32b   :  { %v407_v34 = vadd.f32 %v812_v48, %v406_v33 }
 0x32c   :  { %497 = vst [vmem:[#allocation2 + $0x38] sm:$0xff] %v481_v32 }
 0x32d   :  { %v434_v35 = vmul.f32 0.5, %v407_v34 }
 0x32f   :  { %627 = vtanh.f32 %v434_v35 }
 0x332   :  { %v408_v36 = vpop.f32.mrf.mxu3 }
 0x333   :  { %v409_v37 = vadd.f32 %v812_v48, %v408_v36 }
 0x335   :  { %v628_v38 = vpop.eup %627  ;;  %v435_v39 = vmul.f32 0.5, %v409_v37 }
 0x336   :  { %v466_v40 = vadd.f32 1.0, %v628_v38 }
 0x337   :  { %629 = vtanh.f32 %v435_v39 }
 0x338   :  { %v482_v41 = vmul.f32 0.5, %v466_v40 }
 0x33a   :  { %498 = vst [vmem:[#allocation2 + $0x40] sm:$0xff] %v482_v41  ;;  %v411_v42 = vpop.f32.mrf.mxu3 }
 0x33b   :  { %v412_v43 = vadd.f32 %v812_v48, %v411_v42 }
 0x33d   :  { %v630_v44 = vpop.eup %629  ;;  %v436_v45 = vmul.f32 0.5, %v412_v43 }
 0x33e   :  { %v467_v46 = vadd.f32 1.0, %v630_v44 }
 0x33f   :  { %631 = vtanh.f32 %v436_v45 }
 0x340   :  { %v483_v47 = vmul.f32 0.5, %v467_v46 }
 0x342   :  { %499 = vst [vmem:[#allocation2 + $0x48] sm:$0xff] %v483_v47  ;;  %v413_v49 = vpop.f32.mrf.mxu3 }
 0x343   :  { %v414_v50 = vadd.f32 %v812_v48, %v413_v49 }
 0x345   :  { %v632_v51 = vpop.eup %631  ;;  %v437_v52 = vmul.f32 0.5, %v414_v50 }
 0x346   :  { %v468_v53 = vadd.f32 1.0, %v632_v51 }
 0x347   :  { %633 = vtanh.f32 %v437_v52 }
 0x348   :  { %v484_v54 = vmul.f32 0.5, %v468_v53 }
 0x34a   :  { %500 = vst [vmem:[#allocation2 + $0x50] sm:$0xff] %v484_v54  ;;  %v416_v55 = vpop.f32.mrf.mxu3 }
 0x34b   :  { %v417_v56 = vadd.f32 %v812_v48, %v416_v55 }
 0x34d   :  { %v634_v57 = vpop.eup %633  ;;  %v438_v58 = vmul.f32 0.5, %v417_v56 }
 0x34e   :  { %v469_v59 = vadd.f32 1.0, %v634_v57 }
 0x34f   :  { %635 = vtanh.f32 %v438_v58 }
 0x350   :  { %v485_v60 = vmul.f32 0.5, %v469_v59 }
 0x352   :  { %501 = vst [vmem:[#allocation2 + $0x58] sm:$0xff] %v485_v60  ;;  %v418_v61 = vpop.f32.mrf.mxu3 }
 0x353   :  { %v419_v62 = vadd.f32 %v812_v48, %v418_v61 }
 0x355   :  { %v636_v63 = vpop.eup %635  ;;  %v439_v0 = vmul.f32 0.5, %v419_v62 }
 0x356   :  { %v470_v1 = vadd.f32 1.0, %v636_v63 }
 0x357   :  { %637 = vtanh.f32 %v439_v0 }
 0x358   :  { %v486_v2 = vmul.f32 0.5, %v470_v1 }
 0x35a   :  { %502 = vst [vmem:[#allocation2 + $0x60] sm:$0xff] %v486_v2  ;;  %v421_v3 = vpop.f32.mrf.mxu3 }
 0x35b   :  { %v422_v4 = vadd.f32 %v812_v48, %v421_v3 }
 0x35d   :  { %v638_v5 = vpop.eup %637  ;;  %v440_v6 = vmul.f32 0.5, %v422_v4 }
 0x35e   :  { %v471_v7 = vadd.f32 1.0, %v638_v5 }
 0x35f   :  { %639 = vtanh.f32 %v440_v6 }
 0x360   :  { %v487_v8 = vmul.f32 0.5, %v471_v7 }
 0x362   :  { %503 = vst [vmem:[#allocation2 + $0x68] sm:$0xff] %v487_v8  ;;  %v423_v9 = vpop.f32.mrf.mxu3 }
 0x363   :  { %v424_v10 = vadd.f32 %v812_v48, %v423_v9 }
 0x365   :  { %v640_v11 = vpop.eup %639  ;;  %v441_v12 = vmul.f32 0.5, %v424_v10 }
 0x366   :  { %v472_v13 = vadd.f32 1.0, %v640_v11 }
 0x367   :  { %641 = vtanh.f32 %v441_v12 }
 0x368   :  { %v488_v14 = vmul.f32 0.5, %v472_v13 }
 0x36a   :  { %504 = vst [vmem:[#allocation2 + $0x70] sm:$0xff] %v488_v14 }
 0x36d   :  { %v642_v15 = vpop.eup %641 }
 0x36e   :  { %v473_v16 = vadd.f32 1.0, %v642_v15 }
 0x370   :  { %v489_v17 = vmul.f32 0.5, %v473_v16 }
 0x372   :  { %505 = vst [vmem:[#allocation2 + $0x78] sm:$0xff] %v489_v17 }
 0x373   :  { %518 = dma.vmem_to_hbm [thread:$0]  %s511_s10, 2048, %s513_s13, [#allocation3], %s671_s14, %s671_s14, %s672_s15  }
 0x374   :  { %667 = dma.done.wait [#allocation3], 2048  }
 0x375   :  { %668 = vsyncadd [#allocation3], 4294965248 }
 0x376   :  { %523 = vsyncpa [#allocation3], 1 }

</bundles_post_ra>
